<compile_context>
chip_gen: v5e
topology: v5e:2x2
jax: 0.10.0
libtpu: 0.0.40
codegen_flags: <defaults>
</compile_context>

<pallas_src>
import functools

import jax
import jax.numpy as jnp
from jax.experimental import pallas as pl
from jax.experimental.pallas import tpu as pltpu


def _cdiv(a: int, b: int) -> int:
    return -(-a // b)


def _round_up(x: int, m: int) -> int:
    return _cdiv(x, m) * m


def fm_kernel(x_ref, p_ref, o_ref, *, tile_b: int, valid_rows: int,
              mask_tail: bool, precision):
    """x_ref: (tile_b, F*E) input block.  p_ref: (F*E, E) 0/1 field-sum matrix
    (constant block index -> resident in VMEM across the grid).
    o_ref: (1, tile_b) lane-dense output block."""
    x = x_ref[...]

    # Field sum on the MXU: s[b, e] = sum_f x[b, f*E + e]   (f32 accumulate).
    s = jnp.dot(x, p_ref[...], preferred_element_type=jnp.float32,
                precision=precision)                          # (tile_b, E) f32

    # Whole-block sum of squares in f32 (single cross-lane reduce over F*E).
    x32 = x.astype(jnp.float32)
    sq = jnp.sum(x32 * x32, axis=1)                           # (tile_b,)

    # Subtract the per-row sums before the final cast (single epilogue pass).
    cross = 0.5 * (jnp.sum(s * s, axis=1) - sq)               # (tile_b,)
    out = cross[None, :]                                      # (1, tile_b)

    if mask_tail:
        # Tail tile of an unpadded ragged batch: rows >= B hold undefined data
        # read by the partial block; zero them (they are also sliced off).
        rows = pl.program_id(0) * tile_b + jax.lax.broadcasted_iota(
            jnp.int32, (1, tile_b), 1)
        out = jnp.where(rows < valid_rows, out, 0.0)

    o_ref[...] = out.astype(o_ref.dtype)


def fm_forward(x: jax.Array, *, tile_b: int | None = None,
               input_buffers: int = 2) -> jax.Array:
    """FM forward. x: (B, F, E) -> (B, 1), same dtype as input."""
    B, F, E = x.shape
    FE = F * E
    itemsize = jnp.dtype(x.dtype).itemsize

    # Free layout change: (B, F, E) is contiguous, so this is a view.
    x2d = x.reshape(B, FE)
    # Constant 0/1 field-sum matrix: P[f*E + e, e] = 1.
    p = jnp.tile(jnp.eye(E, dtype=x.dtype), (F, 1))           # (FE, E)

    # f32 inputs need multi-pass MXU emulation to keep f32 accuracy; bf16/f8
    # inputs are native single-pass regardless.
    precision = (jax.lax.Precision.HIGHEST if x.dtype == jnp.float32
                 else jax.lax.Precision.DEFAULT)

    # --- VMEM budget (chip-aware; conservative v7x fallback) ---------------
    try:
        phys_vmem = int(pltpu.get_tpu_info().vmem_capacity_bytes)
    except Exception:
        phys_vmem = 64 * 1024 * 1024
    # 32 MiB scoped budget on v7x (64 MiB physical), 64 MiB on v5e/v6e (128 MiB).
    vmem_budget = min(phys_vmem // 2, 64 * 1024 * 1024)

    # --- Tile sizing --------------------------------------------------------
    if B <= 128:
        # Single exact tile: block dims equal the full array dims, so no
        # padding, no partial blocks, no masking. (Padding a <=128-row batch
        # would cost nothing, but it is simply not needed.)
        tile_b = B
        num_tiles = 1
        mask_tail = False
    else:
        if tile_b is None:
            # Per-row working set: pipelined input rows + ~2 block-sized f32
            # temporaries (cast + square) + small (E-wide) f32 intermediates.
            per_row = FE * (input_buffers * itemsize + 2 * 4) + 2 * E * 4
            budget_rows = max((vmem_budget * 3 // 4) // per_row, 128)
            tile_b = (budget_rows // 128) * 128
            # Keep >= ~4 grid steps when the batch allows it (v7x two-TC split
            # via "parallel" semantics + HBM/compute pipelining).
            k128 = _cdiv(B, 128)
            tile_b = min(tile_b, max(128, _cdiv(k128, 4) * 128))
        assert tile_b % 128 == 0 and tile_b >= 128, \
            "tile_b must be a multiple of 128 (lane-dense output)"
        num_tiles = _cdiv(B, tile_b)
        mask_tail = (num_tiles * tile_b != B)

    # --- VMEM limit derived from actual block bytes -------------------------
    vmem_needed = (input_buffers * tile_b * FE * itemsize    # pipelined input
                   + 2 * tile_b * FE * 4                     # f32 temporaries
                   + 2 * tile_b * E * 4                      # s, s*s
                   + 2 * FE * E * itemsize                   # resident P
                   + 2 * tile_b * 4)                         # output block
    vmem_limit = int(min(max(vmem_budget, vmem_needed + (2 << 20), 16 << 20),
                         phys_vmem - (8 << 20)))

    kernel = functools.partial(fm_kernel, tile_b=tile_b, valid_rows=B,
                               mask_tail=mask_tail, precision=precision)

    # Input block spec; pl.Buffered(3) is worth sweeping on v5e once tiles are
    # large (exposed DMA latency) — default stays at standard double buffering.
    if input_buffers == 2:
        x_spec = pl.BlockSpec((tile_b, FE), lambda b: (b, 0))
    else:
        x_spec = pl.BlockSpec((tile_b, FE), lambda b: (b, 0),
                              pipeline_mode=pl.Buffered(input_buffers))

    out_tiles = pl.pallas_call(
        kernel,
        out_shape=jax.ShapeDtypeStruct((num_tiles, tile_b), x.dtype),
        grid_spec=pltpu.PrefetchScalarGridSpec(
            num_scalar_prefetch=0,
            grid=(num_tiles,),
            in_specs=[
                x_spec,
                # Constant block index -> fetched once, stays VMEM-resident.
                pl.BlockSpec((FE, E), lambda b: (0, 0)),
            ],
            # Lane-dense output block: last dim = tile_b.
            out_specs=pl.BlockSpec((1, tile_b), lambda b: (b, 0)),
        ),
        compiler_params=pltpu.CompilerParams(
            dimension_semantics=("parallel",),
            vmem_limit_bytes=vmem_limit,
        ),
        cost_estimate=pl.CostEstimate(
            flops=2 * B * FE * E + 4 * B * FE,
            transcendentals=0,
            bytes_accessed=B * FE * itemsize + FE * E * itemsize + B * itemsize,
        ),
    )(x2d, p)

    # Rows >= B of the last tile are masked to 0 in-kernel and dropped here.
    return out_tiles.reshape(num_tiles * tile_b)[:B].reshape(B, 1)


def fm_reference(x: jax.Array) -> jax.Array:
    xf = x.astype(jnp.float32)
    square_of_sum = jnp.sum(xf, axis=1, keepdims=True) ** 2
    sum_of_square = jnp.sum(xf * xf, axis=1, keepdims=True)
    cross = square_of_sum - sum_of_square
    return (0.5 * jnp.sum(cross, axis=2)).astype(x.dtype)


if __name__ == "__main__":
    key = jax.random.PRNGKey(0)
    # (batch_size, field_size, embedding_size) as in the PyTorch module.
    B, F, E = 2, 4, 32
    x = jax.random.normal(key, (B, F, E), dtype=jnp.float32)

    out = fm_forward(x)
    jax.block_until_ready(out)
    ref = fm_reference(x)
    assert out.shape == (B, 1), out.shape
    assert jnp.allclose(out, ref, atol=5e-4, rtol=5e-4), (out, ref)

    # Multi-tile ragged batch: exercises the no-pad partial tail block + the
    # in-kernel row mask (auto tile sizing picks tile_b=128 -> 3 grid steps).
    B2 = 300
    x2 = jax.random.normal(jax.random.PRNGKey(1), (B2, F, E), dtype=jnp.float32)
    out2 = fm_forward(x2)
    jax.block_until_ready(out2)
    ref2 = fm_reference(x2)
    assert out2.shape == (B2, 1), out2.shape
    assert jnp.allclose(out2, ref2, atol=5e-4, rtol=5e-4)

    print("KERNEL_OK")
</pallas_src>

<mosaic_0001>
module attributes {stable_mosaic.version = 11 : i64} {
  func.func @fm_kernel(%arg0: i32, %arg1: memref<2x128xf32, #tpu.memory_space<vmem>>, %arg2: memref<128x32xf32, #tpu.memory_space<vmem>>, %arg3: memref<1x2xf32, #tpu.memory_space<vmem>>) attributes {dimension_semantics = [#tpu.dimension_semantics<parallel>], iteration_bounds = array<i64: 1>, scalar_prefetch = 0 : i64, scratch_operands = 0 : i64, tpu.core_type = #tpu.core_type<tc>, window_params = [{transform_indices = @transform_0, window_bounds = array<i64: 2, 128>}, {pipeline_mode = #tpu.pipeline_mode<synchronous>, transform_indices = @transform_1, window_bounds = array<i64: 128, 32>}, {transform_indices = @transform_2, window_bounds = array<i64: 1, 2>}]} {
    %c0 = arith.constant 0 : index
    %c0_0 = arith.constant 0 : index
    %0 = vector.load %arg1[%c0, %c0_0] : memref<2x128xf32, #tpu.memory_space<vmem>>, vector<2x128xf32>
    %c0_1 = arith.constant 0 : index
    %c0_2 = arith.constant 0 : index
    %1 = vector.load %arg2[%c0_1, %c0_2] : memref<128x32xf32, #tpu.memory_space<vmem>>, vector<128x32xf32>
    %cst = arith.constant dense<0.000000e+00> : vector<2x32xf32>
    %2 = tpu.matmul %0, %1, %cst {dimension_numbers = #tpu.dot_dimension_numbers<[1], [0], [0], [1], [0, 0, 1, 1], [], []>, precision = #tpu.contract_precision<fp32>} : vector<2x128xf32>, vector<128x32xf32>, vector<2x32xf32> -> vector<2x32xf32>
    %3 = arith.mulf %0, %0 : vector<2x128xf32>
    %cst_3 = arith.constant dense<0.000000e+00> : vector<2xf32>
    %4 = vector.multi_reduction <add>, %3, %cst_3 [1] : vector<2x128xf32> to vector<2xf32>
    %5 = arith.mulf %2, %2 : vector<2x32xf32>
    %cst_4 = arith.constant dense<0.000000e+00> : vector<2xf32>
    %6 = vector.multi_reduction <add>, %5, %cst_4 [1] : vector<2x32xf32> to vector<2xf32>
    %7 = arith.subf %6, %4 : vector<2xf32>
    %cst_5 = arith.constant 5.000000e-01 : f32
    %8 = vector.broadcast %cst_5 : f32 to vector<2xf32>
    %9 = arith.mulf %8, %7 : vector<2xf32>
    %10 = vector.shape_cast %9 : vector<2xf32> to vector<1x2xf32>
    %c0_6 = arith.constant 0 : index
    %c0_7 = arith.constant 0 : index
    %11 = vector.load %arg3[%c0_6, %c0_7] : memref<1x2xf32, #tpu.memory_space<vmem>>, vector<1x2xf32>
    tpu.vector_store %arg3[%c0_6, %c0_7], %10 {strides = array<i32>} : memref<1x2xf32, #tpu.memory_space<vmem>>, vector<1x2xf32>,
    return
  }
  func.func @transform_0(%arg0: i32) -> (i32, i32) {
    %c0_i32 = arith.constant 0 : i32
    %c0_i32_0 = arith.constant 0 : i32
    return %arg0, %c0_i32 : i32, i32
  }
  func.func @transform_1(%arg0: i32) -> (i32, i32) {
    %c0_i32 = arith.constant 0 : i32
    %c0_i32_0 = arith.constant 0 : i32
    %c0_i32_1 = arith.constant 0 : i32
    return %c0_i32, %c0_i32_0 : i32, i32
  }
  func.func @transform_2(%arg0: i32) -> (i32, i32) {
    %c0_i32 = arith.constant 0 : i32
    %c0_i32_0 = arith.constant 0 : i32
    return %arg0, %c0_i32 : i32, i32
  }
}

</mosaic_0001>

<bundles_post_ra>
// kernel: tpu_custom_call.1
= control target key start
LH: loop header
LB: loop body
LE: loop exit
PB: predicated region body
PF: predicated region fallthrough
CT: control target
= control target key end

     0   :  { %s746_s0 = inlined_call_operand.vmem [shape: f32[2,128], index: 0, kind: input, shape index: {}]   ;;  %s747_s1 = inlined_call_operand.vmem [shape: f32[128,32], index: 1, kind: input, shape index: {}]   ;;  %s748_s2 = inlined_call_operand.hbm [shape: f32[1,2], index: 2, kind: output, shape index: {}]  }
   0x1   :  { %v28_v0 = vld [vmem:[%s747_s1 + $0x78] sm:$0xff]  ;;  %v27_v1 = vld [vmem:[%s747_s1 + $0x70] sm:$0xff]  ;;  %v26_v2 = vld [vmem:[%s747_s1 + $0x68] sm:$0xff] }
   0x2   :  { %v457_v3 = vand.u32 4294901760, %v28_v0  ;;  %v459_v4 = vand.u32 4294901760, %v27_v1  ;;  %v461_v5 = vand.u32 4294901760, %v26_v2  ;;  %v25_v6 = vld [vmem:[%s747_s1 + $0x60] sm:$0xff]  ;;  %v24_v7 = vld [vmem:[%s747_s1 + $0x58] sm:$0xff]  ;;  %v23_v8 = vld [vmem:[%s747_s1 + $0x50] sm:$0xff] }
   0x3   :  { %v472_v9 = vand.u32 4294901760, %v25_v6  ;;  %v474_v10 = vand.u32 4294901760, %v24_v7  ;;  %v476_v11 = vand.u32 4294901760, %v23_v8  ;;  %v22_v12 = vld [vmem:[%s747_s1 + $0x48] sm:$0xff]  ;;  %v21_v13 = vld [vmem:[%s747_s1 + $0x40] sm:$0xff]  ;;  %v20_v18 = vld [vmem:[%s747_s1 + $0x38] sm:$0xff] }
   0x4   :  { %30 = vmatpush.msra.mxu0 %v457_v3  ;;  %v486_v14 = vsub.f32 %v28_v0, %v457_v3  ;;  %v489_v15 = vsub.f32 %v27_v1, %v459_v4  ;;  %v492_v16 = vsub.f32 %v26_v2, %v461_v5  ;;  %v494_v17 = vand.u32 4294901760, %v22_v12  ;;  %226 = vmatpush.msra.mxu3 %v457_v3  ;;  %v19_v26 = vld [vmem:[%s747_s1 + $0x30] sm:$0xff] }
   0x5   :  { %v501_v19 = vsub.f32 %v25_v6, %v472_v9  ;;  %v504_v20 = vsub.f32 %v24_v7, %v474_v10  ;;  %v507_v21 = vsub.f32 %v23_v8, %v476_v11  ;;  %v513_v25 = vand.u32 4294901760, %v21_v13 }
   0x6   :  { %32 = vmatpush.msra.mxu0 %v459_v4  ;;  %v72_v22 = vand.u32 4294901760, %v486_v14  ;;  %v78_v23 = vand.u32 4294901760, %v489_v15  ;;  %v84_v24 = vand.u32 4294901760, %v492_v16  ;;  %173 = vmatpush.msra.mxu2 %v486_v14  ;;  %v520_v28 = vand.u32 4294901760, %v20_v18 }
   0x7   :  { %v90_v27 = vand.u32 4294901760, %v501_v19  ;;  %v523_v29 = vsub.f32 %v22_v12, %v494_v17  ;;  %228 = vmatpush.msra.mxu3 %v459_v4 }
   0x8   :  { %7 = vsyncpa [#allocation3], 0  ;;  %34 = vmatpush.msra.mxu0 %v461_v5  ;;  %v73_v30 = vsub.f32 %v486_v14, %v72_v22  ;;  %v79_v31 = vsub.f32 %v489_v15, %v78_v23  ;;  %v85_v32 = vsub.f32 %v492_v16, %v84_v24  ;;  %v96_v33 = vand.u32 4294901760, %v504_v20  ;;  %176 = vmatpush.msra.mxu2 %v489_v15  ;;  %v18_v36 = vld [vmem:[%s747_s1 + $0x28] sm:$0xff]  ;;  %v17_v42 = vld [vmem:[%s747_s1 + $0x20] sm:$0xff]  ;;  %s396_s17 = sshll.u32 %s748_s2, 4  ;;  %s397_s17 = int_to_ptr.hbm [resolvable:$true] %s396_s17 }
   0x9   :  { %v102_v34 = vand.u32 4294901760, %v507_v21  ;;  %v539_v35 = vand.u32 4294901760, %v19_v26  ;;  %230 = vmatpush.msra.mxu3 %v461_v5  ;;  %v91_v39 = vsub.f32 %v501_v19, %v90_v27  ;;  %v550_v40 = vsub.f32 %v21_v13, %v513_v25  ;;  %v16_v47 = vld [vmem:[%s747_s1 + $0x18] sm:$0xff]  ;;  %v15_v55 = vld [vmem:[%s747_s1 + $0x10] sm:$0xff]  ;;  %v14_v60 = vld [vmem:[%s747_s1 + $0x8] sm:$0xff] }
   0xa   :  { %v74_v37 = vand.u32 4294901760, %v73_v30  ;;  %36 = vmatpush.msra.mxu0 %v472_v9  ;;  %v80_v38 = vand.u32 4294901760, %v79_v31  ;;  %179 = vmatpush.msra.mxu2 %v492_v16  ;;  %v108_v41 = vand.u32 4294901760, %v523_v29  ;;  %v86_v43 = vand.u32 4294901760, %v85_v32  ;;  %v13_v1 = vld [vmem:[%s747_s1] sm:$0xff] }
   0xb   :  { %232 = vmatpush.msra.mxu3 %v472_v9  ;;  %v97_v44 = vsub.f32 %v504_v20, %v96_v33  ;;  %v562_v45 = vand.u32 4294901760, %v18_v36  ;;  %v565_v46 = vsub.f32 %v20_v18, %v520_v28  ;;  %v103_v48 = vsub.f32 %v507_v21, %v102_v34  ;;  %v623_v7 = vld [vmem:[%s746_s0] sm:$0x3]  ;;  %s432_s0 = smov [#allocation2]  }
   0xc   :  { %75 = vmatpush.msra.mxu1 %v74_v37  ;;  %38 = vmatpush.msra.mxu0 %v474_v10  ;;  %v92_v49 = vand.u32 4294901760, %v91_v39  ;;  %v114_v50 = vand.u32 4294901760, %v550_v40  ;;  %v577_v51 = vand.u32 4294901760, %v17_v42  ;;  %v580_v52 = vsub.f32 %v19_v26, %v539_v35  ;;  %s394_s1 = sshll.u32 %s432_s0, 4  ;;  %s395_s1 = int_to_ptr.vmem [resolvable:$true] %s394_s1 }
   0xd   :  { %182 = vmatpush.msra.mxu2 %v501_v19  ;;  %234 = vmatpush.msra.mxu3 %v474_v10  ;;  %v109_v53 = vsub.f32 %v523_v29, %v108_v41  ;;  %v585_v54 = vand.u32 4294901760, %v16_v47  ;;  %v98_v56 = vand.u32 4294901760, %v97_v44  ;;  %v120_v57 = vand.u32 4294901760, %v565_v46 }
   0xe   :  { %81 = vmatpush.msra.mxu1 %v80_v38  ;;  %40 = vmatpush.msra.mxu0 %v476_v11  ;;  %v595_v58 = vsub.f32 %v18_v36, %v562_v45  ;;  %v104_v59 = vand.u32 4294901760, %v103_v48  ;;  %v115_v61 = vsub.f32 %v550_v40, %v114_v50  ;;  %v126_v62 = vand.u32 4294901760, %v580_v52 }
   0xf   :  { %185 = vmatpush.msra.mxu2 %v504_v20  ;;  %236 = vmatpush.msra.mxu3 %v476_v11  ;;  %v607_v63 = vand.u32 4294901760, %v15_v55  ;;  %v610_v0 = vsub.f32 %v17_v42, %v577_v51  ;;  %v110_v2 = vand.u32 4294901760, %v109_v53  ;;  %v616_v6 = vsub.f32 %v16_v47, %v585_v54 }
  0x10   :  { %87 = vmatpush.msra.mxu1 %v86_v43  ;;  %42 = vmatpush.msra.mxu0 %v494_v17  ;;  %v121_v8 = vsub.f32 %v565_v46, %v120_v57  ;;  %v132_v12 = vand.u32 4294901760, %v595_v58  ;;  %v630_v13 = vand.u32 4294901760, %v14_v60  ;;  %v633_v18 = vand.u32 4294901760, %v623_v7 }
  0x11   :  { %188 = vmatpush.msra.mxu2 %v507_v21  ;;  %238 = vmatpush.msra.mxu3 %v494_v17  ;;  %v635_v26 = vand.u32 4294901760, %v13_v1  ;;  %v116_v30 = vand.u32 4294901760, %v115_v61  ;;  %v127_v31 = vsub.f32 %v580_v52, %v126_v62  ;;  %v138_v32 = vand.u32 4294901760, %v610_v0 }
  0x12   :  { %93 = vmatpush.msra.mxu1 %v92_v49  ;;  %44 = vmatpush.msra.mxu0 %v513_v25  ;;  %v645_v36 = vsub.f32 %v15_v55, %v607_v63  ;;  %v144_v37 = vand.u32 4294901760, %v616_v6  ;;  %v122_v38 = vand.u32 4294901760, %v121_v8  ;;  %v133_v39 = vsub.f32 %v595_v58, %v132_v12 }
  0x13   :  { %191 = vmatpush.msra.mxu2 %v523_v29  ;;  %240 = vmatpush.msra.mxu3 %v513_v25  ;;  %v655_v42 = vsub.f32 %v14_v60, %v630_v13  ;;  %v62_v43 = vsub.f32 %v623_v7, %v633_v18  ;;  %v128_v44 = vand.u32 4294901760, %v127_v31  ;;  %v139_v47 = vsub.f32 %v610_v0, %v138_v32 }
  0x14   :  { %99 = vmatpush.msra.mxu1 %v98_v56  ;;  %46 = vmatpush.msra.mxu0 %v520_v28  ;;  %v150_v48 = vand.u32 4294901760, %v645_v36  ;;  %v667_v49 = vsub.f32 %v13_v1, %v635_v26  ;;  %v134_v53 = vand.u32 4294901760, %v133_v39  ;;  %v145_v55 = vsub.f32 %v616_v6, %v144_v37 }
  0x15   :  { %194 = vmatpush.msra.mxu2 %v550_v40  ;;  %242 = vmatpush.msra.mxu3 %v520_v28  ;;  %v156_v56 = vand.u32 4294901760, %v655_v42  ;;  %v140_v60 = vand.u32 4294901760, %v139_v47  ;;  %vm371_vm0 = vcmask 1041408   ;;  %vm376_vm1 = vcmask 254976  }
  0x16   :  { %105 = vmatpush.msra.mxu1 %v104_v59  ;;  %48 = vmatpush.msra.mxu0 %v539_v35  ;;  %v63_v59 = vand.u32 4294901760, %v62_v43  ;;  %v151_v61 = vsub.f32 %v645_v36, %v150_v48  ;;  %v162_v1 = vand.u32 4294901760, %v667_v49  ;;  %vm387_vm2 = vcmask 8192  }
  0x17   :  { %197 = vmatpush.msra.mxu2 %v565_v46  ;;  %244 = vmatpush.msra.mxu3 %v539_v35  ;;  %v157_v8 = vsub.f32 %v655_v42, %v156_v56 }
  0x18   :  { %111 = vmatpush.msra.mxu1 %v110_v2  ;;  %50 = vmatpush.msra.mxu0 %v562_v45  ;;  %v146_v2 = vand.u32 4294901760, %v145_v55  ;;  %v152_v31 = vand.u32 4294901760, %v151_v61 }
  0x19   :  { %200 = vmatpush.msra.mxu2 %v580_v52  ;;  %246 = vmatpush.msra.mxu3 %v562_v45  ;;  %v158_v39 = vand.u32 4294901760, %v157_v8 }
  0x1a   :  { %117 = vmatpush.msra.mxu1 %v116_v30  ;;  %52 = vmatpush.msra.mxu0 %v577_v51  ;;  %v64_v30 = vsub.f32 %v62_v43, %v63_v59 }
  0x1b   :  { %203 = vmatpush.msra.mxu2 %v595_v58  ;;  %248 = vmatpush.msra.mxu3 %v577_v51 }
  0x1c   :  { %123 = vmatpush.msra.mxu1 %v122_v38  ;;  %54 = vmatpush.msra.mxu0 %v585_v54  ;;  %v163_v38 = vsub.f32 %v667_v49, %v162_v1 }
  0x1d   :  { %206 = vmatpush.msra.mxu2 %v610_v0  ;;  %250 = vmatpush.msra.mxu3 %v585_v54 }
  0x1e   :  { %129 = vmatpush.msra.mxu1 %v128_v44  ;;  %56 = vmatpush.msra.mxu0 %v607_v63  ;;  %v65_v44 = vand.u32 4294901760, %v64_v30  ;;  %v164_v47 = vand.u32 4294901760, %v163_v38 }
  0x1f   :  { %209 = vmatpush.msra.mxu2 %v616_v6  ;;  %252 = vmatpush.msra.mxu3 %v607_v63 }
  0x20   :  { %135 = vmatpush.msra.mxu1 %v134_v53  ;;  %58 = vmatpush.msra.mxu0 %v630_v13 }
  0x21   :  { %212 = vmatpush.msra.mxu2 %v645_v36  ;;  %254 = vmatpush.msra.mxu3 %v630_v13 }
  0x22   :  { %141 = vmatpush.msra.mxu1 %v140_v60  ;;  %60 = vmatpush.msra.mxu0 %v635_v26 }
  0x23   :  { %215 = vmatpush.msra.mxu2 %v655_v42  ;;  %256 = vmatpush.msra.mxu3 %v635_v26 }
  0x24   :  { %267 = vmatpush.msrb.mxu0 %v72_v22  ;;  %147 = vmatpush.msra.mxu1 %v146_v2 }
  0x25   :  { %218 = vmatpush.msra.mxu2 %v667_v49  ;;  %260 = vmatmul.f32.vlgmr.msra.gmra.mxu3 %v63_v59 }
  0x26   :  { %271 = vmatpush.msrb.mxu0 %v78_v23  ;;  %153 = vmatpush.msra.mxu1 %v152_v31 }
  0x27   :  { %221 = vmatmul.f32.vlgmr.msra.gmra.mxu2 %v62_v43  ;;  %66 = vmatmul.f32.vlgmr.msra.gmra.mxu0 %v65_v44 }
  0x28   :  { %275 = vmatpush.msrb.mxu0 %v84_v24  ;;  %159 = vmatpush.msra.mxu1 %v158_v39 }
  0x2a   :  { %279 = vmatpush.msrb.mxu0 %v90_v27  ;;  %165 = vmatpush.msra.mxu1 %v164_v47 }
  0x2b   :  { %167 = vmatmul.f32.vlgmr.msra.gmra.mxu1 %v633_v18 }
  0x2c   :  { %334 = vmatpush.msrb.mxu1 %v457_v3  ;;  %283 = vmatpush.msrb.mxu0 %v96_v33  ;;  %v370_v3 = vmul.f32 %v623_v7, %v623_v7 }
  0x2e   :  { %336 = vmatpush.msrb.mxu1 %v459_v4  ;;  %287 = vmatpush.msrb.mxu0 %v102_v34  ;;  %v372_v4 = vsel %vm371_vm0, %v370_v3, 0.0 }
  0x2f   :  { %373 = vadd.xlane.f32.xlu0 %v372_v4 }
  0x30   :  { %338 = vmatpush.msrb.mxu1 %v461_v5  ;;  %291 = vmatpush.msrb.mxu0 %v108_v41 }
  0x32   :  { %340 = vmatpush.msrb.mxu1 %v472_v9  ;;  %295 = vmatpush.msrb.mxu0 %v114_v50 }
  0x34   :  { %342 = vmatpush.msrb.mxu1 %v474_v10  ;;  %299 = vmatpush.msrb.mxu0 %v120_v57 }
  0x36   :  { %344 = vmatpush.msrb.mxu1 %v476_v11  ;;  %303 = vmatpush.msrb.mxu0 %v126_v62 }
  0x38   :  { %346 = vmatpush.msrb.mxu1 %v494_v17  ;;  %307 = vmatpush.msrb.mxu0 %v132_v12 }
  0x3a   :  { %348 = vmatpush.msrb.mxu1 %v513_v25  ;;  %311 = vmatpush.msrb.mxu0 %v138_v32  ;;  %v383_v25 = vlaneseq }
  0x3c   :  { %350 = vmatpush.msrb.mxu1 %v520_v28  ;;  %315 = vmatpush.msrb.mxu0 %v144_v37  ;;  %v384_v28 = vand.u32 127, %v383_v25 }
  0x3e   :  { %352 = vmatpush.msrb.mxu1 %v539_v35  ;;  %319 = vmatpush.msrb.mxu0 %v150_v48 }
  0x40   :  { %354 = vmatpush.msrb.mxu1 %v562_v45  ;;  %323 = vmatpush.msrb.mxu0 %v156_v56 }
  0x42   :  { %356 = vmatpush.msrb.mxu1 %v577_v51  ;;  %327 = vmatpush.msrb.mxu0 %v162_v1 }
  0x43   :  { %329 = vmatmul.f32.vlgmr.msrb.gmra.mxu0 %v633_v18 }
  0x44   :  { %358 = vmatpush.msrb.mxu1 %v585_v54 }
  0x46   :  { %360 = vmatpush.msrb.mxu1 %v607_v63 }
  0x48   :  { %362 = vmatpush.msrb.mxu1 %v630_v13 }
  0x4a   :  { %364 = vmatpush.msrb.mxu1 %v635_v26 }
  0x4b   :  { %366 = vmatmul.f32.vlgmr.msrb.gmra.mxu1 %v633_v18 }
  0xa2   :  { %v374_v24 = vpop.xlane.xlu0 %373 }
  0xa4   :  { %v67_v9 = vpop.f32.mrf.mxu0 }
  0xa8   :  { %v168_v5 = vpop.f32.mrf.mxu1  ;;  %v261_v15 = vpop.f32.mrf.mxu3 }
  0xa9   :  { %v169_v10 = vadd.f32 %v168_v5, %v67_v9 }
  0xaa   :  { %v222_v11 = vpop.f32.mrf.mxu2 }
  0xab   :  { %v223_v14 = vadd.f32 %v222_v11, %v169_v10 }
  0xad   :  { %v262_v16 = vadd.f32 %v261_v15, %v223_v14 }
  0xc0   :  { %v330_v17 = vpop.f32.mrf.mxu0 }
  0xc1   :  { %v331_v19 = vadd.f32 %v330_v17, %v262_v16 }
  0xc8   :  { %v367_v20 = vpop.f32.mrf.mxu1 }
  0xc9   :  { %v368_v21 = vadd.f32 %v367_v20, %v331_v19 }
  0xcb   :  { %v375_v22 = vmul.f32 %v368_v21, %v368_v21 }
  0xcd   :  { %v377_v23 = vsel %vm376_vm1, %v375_v22, 0.0 }
  0xce   :  { %378 = vadd.xlane.f32.xlu0 %v377_v23 }
 0x141   :  { %v379_v27 = vpop.xlane.xlu0 %378 }
 0x142   :  { %v380_v29 = vsub.f32 %v379_v27, %v374_v24 }
 0x144   :  { %v381_v33 = vmul.f32 0.5, %v380_v29 }
 0x146   :  { %v385_v34 = vperm.slane %v381_v33, %v384_v28 }
 0x148   :  { %388 = vst.msk [vmem:[#allocation2] sm:$0x1] %vm387_vm2, %v385_v34 }
 0x149   :  { %399 = dma.vmem_to_hbm [thread:$0]  %s395_s1, 16, %s397_s17, [#allocation3]  }
 0x14a   :  { %430 = dma.done.wait [#allocation3], 16  }
 0x14b   :  { %431 = vsyncadd [#allocation3], 4294967280 }
 0x14c   :  { %404 = vsyncpa [#allocation3], 1 }

</bundles_post_ra>
